<compile_context>
chip_gen: v6e
topology: v6e:2x2x1
jax: 0.10.0
libtpu: 0.0.40
codegen_flags: <defaults>
</compile_context>

<pallas_src>
import functools

import jax
import jax.numpy as jnp
from jax import lax
from jax.experimental import pallas as pl
from jax.experimental.pallas import tpu as pltpu

EPS = 1e-5                      # nn.InstanceNorm2d default
LANE = 128
MATMUL_DTYPE = jnp.bfloat16     # MXU-native operands; accumulation stays f32


# ----------------------------- Pallas kernel --------------------------------
def _deconv_kernel(p_ref, w_ref, g_ref, bt_ref, o_ref, sum_ref, ssq_ref,
                   *, inv_n, tile_p):
    # p_ref  : (1, KKC, TILE_P) bf16  im2col patch tile (spatial on lanes)
    # w_ref  : (Cout, KKC)      bf16  conv weight, cols in (ki, kj, cin) order
    # g_ref  : (Cout, 1)        f32   instance-norm gamma
    # bt_ref : (Cout, 1)        f32   instance-norm beta
    # o_ref  : (1, Cout, Pp)    f32   resident output block for this batch elem
    # sum_ref/ssq_ref : (Cout, 1) f32 running per-channel sum / sum-of-squares
    p_idx = pl.program_id(1)
    n_p = pl.num_programs(1)

    @pl.when(p_idx == 0)
    def _():
        sum_ref[...] = jnp.zeros_like(sum_ref)
        ssq_ref[...] = jnp.zeros_like(ssq_ref)

    # Conv2d tile as a lane-dense MXU matmul: (Cout, KKC) @ (KKC, TILE_P).
    # (No bias add: it is cancelled exactly by the instance-norm mean subtraction.)
    y = jnp.dot(w_ref[...], p_ref[0], preferred_element_type=jnp.float32)

    # Single-pass stats (f32): mean = E[y], var = E[y^2] - mean^2 at finalize.
    # Padded (zero) patch columns contribute 0 to both sums; inv_n uses the true P.
    sum_ref[...] += jnp.sum(y, axis=1, keepdims=True)
    ssq_ref[...] += jnp.sum(y * y, axis=1, keepdims=True)

    # Stash the raw conv tile into the VMEM-resident output block (lane-aligned).
    start = pl.multiple_of(p_idx * tile_p, tile_p)
    o_ref[0, :, pl.ds(start, tile_p)] = y

    # Last P tile of this batch element: normalize + affine + ReLU in place.
    @pl.when(p_idx == n_p - 1)
    def _():
        mean = sum_ref[...] * inv_n                       # (Cout, 1)
        var = ssq_ref[...] * inv_n - mean * mean
        scale = g_ref[...] * lax.rsqrt(var + EPS)         # (Cout, 1)
        shift = bt_ref[...] - mean * scale
        o_ref[0] = jnp.maximum(o_ref[0] * scale + shift, 0.0)


# ------------------------------ JAX glue -------------------------------------
def _reflect_nearest_index(n_pad, pad, n_up):
    """Padded coord -> source coord of (nearest-2x-upsample then reflection-pad)."""
    a = jnp.arange(n_pad, dtype=jnp.int32) - pad
    a = jnp.abs(a)                                   # left reflection (no edge repeat)
    a = jnp.where(a >= n_up, 2 * n_up - 2 - a, a)    # right reflection
    return a // 2                                    # nearest upsample: u -> u // 2


def _pick_tile_p(p_total, kkc, elem_bytes, max_tile_p):
    """Largest 128-multiple tile that fits a conservative (v7x-safe) VMEM budget."""
    budget = 12 * 1024 * 1024            # double-buffered patch tiles budget
    p_ceil = pl.cdiv(p_total, LANE) * LANE
    by_budget = max(LANE, budget // (2 * kkc * elem_bytes))
    tile = min(max_tile_p, by_budget, p_ceil)
    return max(LANE, (tile // LANE) * LANE)


def deconv_layer(x_nchw, weight, bias, gamma, beta, kernel_size, *, max_tile_p=2048):
    """Forward pass of DeconvLayer (stride=1, pad='reflect', upsample='nearest',
    activation='relu', normalization='instance').

    x_nchw : (B, C_in, H, W)
    weight : (C_out, C_in, k, k)   (PyTorch Conv2d layout)
    bias   : (C_out,)   -- accepted for interface parity; mathematically cancelled
                           by InstanceNorm's mean subtraction, so never computed.
    gamma  : (C_out,)   instance-norm weight
    beta   : (C_out,)   instance-norm bias
    """
    del bias  # exactly cancelled by the per-channel mean subtraction of InstanceNorm

    B, Cin, H, W = x_nchw.shape
    Cout = weight.shape[0]
    k = kernel_size
    pad = k // 2
    Hu, Wu = 2 * H, 2 * W
    Hp, Wp = Hu + 2 * pad, Wu + 2 * pad
    Ho, Wo = Hp - k + 1, Wp - k + 1
    P = Ho * Wo
    KKC = k * k * Cin

    # Fused nearest-2x upsample + reflection pad via a single gather on bf16 input.
    row_map = _reflect_nearest_index(Hp, pad, Hu)
    col_map = _reflect_nearest_index(Wp, pad, Wu)
    xq = x_nchw.astype(MATMUL_DTYPE)
    x_pad = xq[:, :, row_map, :][:, :, :, col_map]            # (B, Cin, Hp, Wp)

    # im2col in (B, KKC, P) orientation: spatial P on the lane axis, bf16.
    # TODO(synk): form the k*k taps in-kernel from x_pad to cut the ~k^2x HBM patch
    # traffic (needs an in-kernel strided spatial flatten for the (Cin,Ho,Wo) slabs).
    taps = [x_pad[:, :, ki:ki + Ho, kj:kj + Wo]
            for ki in range(k) for kj in range(k)]
    patches = jnp.stack(taps, axis=1).reshape(B, KKC, P)      # rows: (ki,kj,ci)

    elem_bytes = jnp.dtype(MATMUL_DTYPE).itemsize
    tile_p = _pick_tile_p(P, KKC, elem_bytes, max_tile_p)
    n_tiles = pl.cdiv(P, tile_p)
    Pp = n_tiles * tile_p
    if Pp != P:
        patches = jnp.pad(patches, ((0, 0), (0, 0), (0, Pp - P)))

    # weight (Cout, Cin, k, k) -> (Cout, KKC) with cols in (ki, kj, ci) order.
    w_mat = jnp.transpose(weight, (0, 2, 3, 1)).reshape(Cout, KKC).astype(MATMUL_DTYPE)
    g_col = gamma.astype(jnp.float32).reshape(Cout, 1)
    bt_col = beta.astype(jnp.float32).reshape(Cout, 1)

    kernel = functools.partial(_deconv_kernel, inv_n=1.0 / float(P), tile_p=tile_p)

    out = pl.pallas_call(
        kernel,
        out_shape=jax.ShapeDtypeStruct((B, Cout, Pp), jnp.float32),
        grid_spec=pltpu.PrefetchScalarGridSpec(
            num_scalar_prefetch=0,
            grid=(B, n_tiles),
            in_specs=[
                pl.BlockSpec((1, KKC, tile_p), lambda b, p: (b, 0, p)),
                pl.BlockSpec((Cout, KKC), lambda b, p: (0, 0)),
                pl.BlockSpec((Cout, 1), lambda b, p: (0, 0)),
                pl.BlockSpec((Cout, 1), lambda b, p: (0, 0)),
            ],
            # Output block is resident across the (arbitrary) P axis and written
            # back to HBM once per batch element, already in NCHW order.
            out_specs=pl.BlockSpec((1, Cout, Pp), lambda b, p: (b, 0, 0)),
            scratch_shapes=[
                pltpu.VMEM((Cout, 1), jnp.float32),   # running sum
                pltpu.VMEM((Cout, 1), jnp.float32),   # running sum of squares
            ],
        ),
        compiler_params=pltpu.CompilerParams(
            dimension_semantics=("parallel", "arbitrary"),
            vmem_limit_bytes=64 * 1024 * 1024,
        ),
    )(patches, w_mat, g_col, bt_col)

    # (B, Cout, Pp) -> drop P padding -> NCHW (no transpose needed).
    return out[:, :, :P].reshape(B, Cout, Ho, Wo)


# --------------------------- pure-JAX reference -------------------------------
def _reference(x_nchw, weight, bias, gamma, beta, k):
    x = x_nchw.astype(jnp.float32)
    pad = k // 2
    x = jnp.repeat(jnp.repeat(x, 2, axis=2), 2, axis=3)
    x = jnp.pad(x, ((0, 0), (0, 0), (pad, pad), (pad, pad)), mode="reflect")
    y = lax.conv_general_dilated(
        x, weight.astype(jnp.float32),
        window_strides=(1, 1), padding="VALID",
        dimension_numbers=("NCHW", "OIHW", "NCHW"),
    ) + bias.reshape(1, -1, 1, 1)
    mean = jnp.mean(y, axis=(2, 3), keepdims=True)
    var = jnp.mean((y - mean) ** 2, axis=(2, 3), keepdims=True)
    y = (y - mean) * lax.rsqrt(var + EPS)
    y = y * gamma.reshape(1, -1, 1, 1) + beta.reshape(1, -1, 1, 1)
    return jnp.maximum(y, 0.0)


# ---------------------------------- main --------------------------------------
if __name__ == "__main__":
    # DeconvLayer(in_ch=4, out_ch=8, kernel_size=3, stride=1)
    B, Cin, H, W = 2, 4, 8, 8
    Cout, k = 8, 3

    key = jax.random.PRNGKey(0)
    kx, kw, kb, kg, kbt = jax.random.split(key, 5)

    x = jax.random.normal(kx, (B, Cin, H, W), dtype=jnp.float32)
    weight = jax.random.normal(kw, (Cout, Cin, k, k), dtype=jnp.float32) * 0.1
    bias = jax.random.normal(kb, (Cout,), dtype=jnp.float32) * 0.1
    gamma = 1.0 + 0.1 * jax.random.normal(kg, (Cout,), dtype=jnp.float32)
    beta = 0.1 * jax.random.normal(kbt, (Cout,), dtype=jnp.float32)

    out = jax.block_until_ready(deconv_layer(x, weight, bias, gamma, beta, k))
    assert out.shape == (B, Cout, 2 * H, 2 * W), out.shape

    # Reference on the same bf16-quantized conv operands (isolates the documented
    # mixed-precision MXU cast from kernel correctness) ...
    xq = x.astype(MATMUL_DTYPE).astype(jnp.float32)
    wq = weight.astype(MATMUL_DTYPE).astype(jnp.float32)
    ref_q = jax.block_until_ready(_reference(xq, wq, bias, gamma, beta, k))
    # ... and the full-f32 reference as a loose sanity bound on the bf16 cast.
    ref_f = jax.block_until_ready(_reference(x, weight, bias, gamma, beta, k))

    err_q = float(jnp.max(jnp.abs(out - ref_q)))
    err_f = float(jnp.max(jnp.abs(out - ref_f)))
    assert err_q < 2e-3, f"mismatch vs quantization-matched reference: {err_q}"
    assert err_f < 1e-1, f"mismatch vs f32 reference: {err_f}"

    # Force the multi-tile P path (2 tiles of 128) to validate tiled-stat accumulation.
    out_tiled = jax.block_until_ready(
        deconv_layer(x, weight, bias, gamma, beta, k, max_tile_p=128))
    assert float(jnp.max(jnp.abs(out - out_tiled))) < 1e-4

    # Non-128-multiple spatial size exercises the P-padding path.
    H2, W2 = 6, 10
    x2 = jax.random.normal(jax.random.PRNGKey(1), (B, Cin, H2, W2), dtype=jnp.float32)
    out2 = jax.block_until_ready(deconv_layer(x2, weight, bias, gamma, beta, k))
    ref2 = jax.block_until_ready(
        _reference(x2.astype(MATMUL_DTYPE).astype(jnp.float32), wq, bias, gamma, beta, k))
    assert out2.shape == (B, Cout, 2 * H2, 2 * W2), out2.shape
    assert float(jnp.max(jnp.abs(out2 - ref2))) < 2e-3

    print("KERNEL_OK")
</pallas_src>

<mosaic_0001>
module attributes {stable_mosaic.version = 11 : i64} {
  func.func @_deconv_kernel(%arg0: i32, %arg1: i32, %arg2: memref<1x36x256xbf16, #tpu.memory_space<vmem>>, %arg3: memref<8x36xbf16, #tpu.memory_space<vmem>>, %arg4: memref<8x1xf32, #tpu.memory_space<vmem>>, %arg5: memref<8x1xf32, #tpu.memory_space<vmem>>, %arg6: memref<1x8x256xf32, #tpu.memory_space<vmem>>, %arg7: memref<8x1xf32, #tpu.memory_space<vmem>>, %arg8: memref<8x1xf32, #tpu.memory_space<vmem>>) attributes {dimension_semantics = [#tpu.dimension_semantics<parallel>, #tpu.dimension_semantics<arbitrary>], iteration_bounds = array<i64: 2, 1>, scalar_prefetch = 0 : i64, scratch_operands = 2 : i64, tpu.core_type = #tpu.core_type<tc>, window_params = [{transform_indices = @transform_0, window_bounds = array<i64: 1, 36, 256>}, {pipeline_mode = #tpu.pipeline_mode<synchronous>, transform_indices = @transform_1, window_bounds = array<i64: 8, 36>}, {pipeline_mode = #tpu.pipeline_mode<synchronous>, transform_indices = @transform_2, window_bounds = array<i64: 8, 1>}, {pipeline_mode = #tpu.pipeline_mode<synchronous>, transform_indices = @transform_3, window_bounds = array<i64: 8, 1>}, {transform_indices = @transform_4, window_bounds = array<i64: 1, 8, 256>}]} {
    %c0_i32 = arith.constant 0 : i32
    %0 = arith.cmpi eq, %arg1, %c0_i32 : i32
    %1 = arith.extui %0 : i1 to i32
    %c0_i32_0 = arith.constant 0 : i32
    %2 = arith.cmpi ne, %1, %c0_i32_0 : i32
    scf.if %2 {
      %cst_19 = arith.constant 0.000000e+00 : f32
      %27 = vector.broadcast %cst_19 : f32 to vector<8x1xf32>
      %c0_20 = arith.constant 0 : index
      %c0_21 = arith.constant 0 : index
      %28 = vector.load %arg7[%c0_20, %c0_21] : memref<8x1xf32, #tpu.memory_space<vmem>>, vector<8x1xf32>
      tpu.vector_store %arg7[%c0_20, %c0_21], %27 {strides = array<i32>} : memref<8x1xf32, #tpu.memory_space<vmem>>, vector<8x1xf32>,
      %cst_22 = arith.constant 0.000000e+00 : f32
      %29 = vector.broadcast %cst_22 : f32 to vector<8x1xf32>
      %c0_23 = arith.constant 0 : index
      %c0_24 = arith.constant 0 : index
      %30 = vector.load %arg8[%c0_23, %c0_24] : memref<8x1xf32, #tpu.memory_space<vmem>>, vector<8x1xf32>
      tpu.vector_store %arg8[%c0_23, %c0_24], %29 {strides = array<i32>} : memref<8x1xf32, #tpu.memory_space<vmem>>, vector<8x1xf32>,
    } else {
    }
    %c0 = arith.constant 0 : index
    %c0_1 = arith.constant 0 : index
    %3 = vector.load %arg3[%c0, %c0_1] : memref<8x36xbf16, #tpu.memory_space<vmem>>, vector<8x36xbf16>
    %c0_2 = arith.constant 0 : index
    %c0_3 = arith.constant 0 : index
    %c0_4 = arith.constant 0 : index
    %4 = vector.load %arg2[%c0_2, %c0_3, %c0_4] : memref<1x36x256xbf16, #tpu.memory_space<vmem>>, vector<1x36x256xbf16>
    %5 = vector.shape_cast %4 : vector<1x36x256xbf16> to vector<36x256xbf16>
    %cst = arith.constant dense<0.000000e+00> : vector<8x256xf32>
    %6 = tpu.matmul %3, %5, %cst {dimension_numbers = #tpu.dot_dimension_numbers<[1], [0], [0], [1], [0, 0, 1, 1], [], []>} : vector<8x36xbf16>, vector<36x256xbf16>, vector<8x256xf32> -> vector<8x256xf32>
    %c0_5 = arith.constant 0 : index
    %c0_6 = arith.constant 0 : index
    %7 = vector.load %arg7[%c0_5, %c0_6] : memref<8x1xf32, #tpu.memory_space<vmem>>, vector<8x1xf32>
    %cst_7 = arith.constant dense<0.000000e+00> : vector<8xf32>
    %8 = vector.multi_reduction <add>, %6, %cst_7 [1] : vector<8x256xf32> to vector<8xf32>
    %9 = vector.shape_cast %8 : vector<8xf32> to vector<8x1xf32>
    %10 = arith.addf %7, %9 : vector<8x1xf32>
    %c0_8 = arith.constant 0 : index
    %c0_9 = arith.constant 0 : index
    %11 = vector.load %arg7[%c0_8, %c0_9] : memref<8x1xf32, #tpu.memory_space<vmem>>, vector<8x1xf32>
    tpu.vector_store %arg7[%c0_8, %c0_9], %10 {strides = array<i32>} : memref<8x1xf32, #tpu.memory_space<vmem>>, vector<8x1xf32>,
    %c0_10 = arith.constant 0 : index
    %c0_11 = arith.constant 0 : index
    %12 = vector.load %arg8[%c0_10, %c0_11] : memref<8x1xf32, #tpu.memory_space<vmem>>, vector<8x1xf32>
    %13 = arith.mulf %6, %6 : vector<8x256xf32>
    %cst_12 = arith.constant dense<0.000000e+00> : vector<8xf32>
    %14 = vector.multi_reduction <add>, %13, %cst_12 [1] : vector<8x256xf32> to vector<8xf32>
    %15 = vector.shape_cast %14 : vector<8xf32> to vector<8x1xf32>
    %16 = arith.addf %12, %15 : vector<8x1xf32>
    %c0_13 = arith.constant 0 : index
    %c0_14 = arith.constant 0 : index
    %17 = vector.load %arg8[%c0_13, %c0_14] : memref<8x1xf32, #tpu.memory_space<vmem>>, vector<8x1xf32>
    tpu.vector_store %arg8[%c0_13, %c0_14], %16 {strides = array<i32>} : memref<8x1xf32, #tpu.memory_space<vmem>>, vector<8x1xf32>,
    %c256_i32 = arith.constant 256 : i32
    %18 = arith.muli %arg1, %c256_i32 : i32
    %19 = tpu.assume_multiple %18, 256 : i32
    %c0_15 = arith.constant 0 : index
    %c0_16 = arith.constant 0 : index
    %20 = arith.index_cast %19 : i32 to index
    %21 = vector.load %arg6[%c0_15, %c0_16, %20] : memref<1x8x256xf32, #tpu.memory_space<vmem>>, vector<1x8x256xf32>
    %22 = vector.shape_cast %21 : vector<1x8x256xf32> to vector<8x256xf32>
    %23 = vector.shape_cast %6 : vector<8x256xf32> to vector<1x8x256xf32>
    tpu.vector_store %arg6[%c0_15, %c0_16, %20], %23 {strides = array<i32>} : memref<1x8x256xf32, #tpu.memory_space<vmem>>, vector<1x8x256xf32>,
    %c0_i32_17 = arith.constant 0 : i32
    %24 = arith.cmpi eq, %arg1, %c0_i32_17 : i32
    %25 = arith.extui %24 : i1 to i32
    %c0_i32_18 = arith.constant 0 : i32
    %26 = arith.cmpi ne, %25, %c0_i32_18 : i32
    scf.if %26 {
      %c0_19 = arith.constant 0 : index
      %c0_20 = arith.constant 0 : index
      %27 = vector.load %arg7[%c0_19, %c0_20] : memref<8x1xf32, #tpu.memory_space<vmem>>, vector<8x1xf32>
      %cst_21 = arith.constant 3.906250e-03 : f32
      %28 = vector.broadcast %cst_21 : f32 to vector<8x1xf32>
      %29 = arith.mulf %27, %28 : vector<8x1xf32>
      %c0_22 = arith.constant 0 : index
      %c0_23 = arith.constant 0 : index
      %30 = vector.load %arg8[%c0_22, %c0_23] : memref<8x1xf32, #tpu.memory_space<vmem>>, vector<8x1xf32>
      %cst_24 = arith.constant 3.906250e-03 : f32
      %31 = vector.broadcast %cst_24 : f32 to vector<8x1xf32>
      %32 = arith.mulf %30, %31 : vector<8x1xf32>
      %33 = arith.mulf %29, %29 : vector<8x1xf32>
      %34 = arith.subf %32, %33 : vector<8x1xf32>
      %c0_25 = arith.constant 0 : index
      %c0_26 = arith.constant 0 : index
      %35 = vector.load %arg4[%c0_25, %c0_26] : memref<8x1xf32, #tpu.memory_space<vmem>>, vector<8x1xf32>
      %cst_27 = arith.constant 9.99999974E-6 : f32
      %36 = vector.broadcast %cst_27 : f32 to vector<8x1xf32>
      %37 = arith.addf %34, %36 : vector<8x1xf32>
      %38 = math.rsqrt %37 : vector<8x1xf32>
      %39 = arith.mulf %35, %38 : vector<8x1xf32>
      %c0_28 = arith.constant 0 : index
      %c0_29 = arith.constant 0 : index
      %40 = vector.load %arg5[%c0_28, %c0_29] : memref<8x1xf32, #tpu.memory_space<vmem>>, vector<8x1xf32>
      %41 = arith.mulf %29, %39 : vector<8x1xf32>
      %42 = arith.subf %40, %41 : vector<8x1xf32>
      %c0_30 = arith.constant 0 : index
      %c0_31 = arith.constant 0 : index
      %c0_32 = arith.constant 0 : index
      %43 = vector.load %arg6[%c0_30, %c0_31, %c0_32] : memref<1x8x256xf32, #tpu.memory_space<vmem>>, vector<1x8x256xf32>
      %44 = vector.shape_cast %43 : vector<1x8x256xf32> to vector<8x256xf32>
      %45 = vector.broadcast %39 : vector<8x1xf32> to vector<8x256xf32>
      %46 = arith.mulf %44, %45 : vector<8x256xf32>
      %47 = vector.broadcast %42 : vector<8x1xf32> to vector<8x256xf32>
      %48 = arith.addf %46, %47 : vector<8x256xf32>
      %cst_33 = arith.constant 0.000000e+00 : f32
      %49 = vector.broadcast %cst_33 : f32 to vector<8x256xf32>
      %50 = arith.maximumf %48, %49 : vector<8x256xf32>
      %c0_34 = arith.constant 0 : index
      %c0_35 = arith.constant 0 : index
      %c0_36 = arith.constant 0 : index
      %51 = vector.load %arg6[%c0_34, %c0_35, %c0_36] : memref<1x8x256xf32, #tpu.memory_space<vmem>>, vector<1x8x256xf32>
      %52 = vector.shape_cast %51 : vector<1x8x256xf32> to vector<8x256xf32>
      %53 = vector.shape_cast %50 : vector<8x256xf32> to vector<1x8x256xf32>
      tpu.vector_store %arg6[%c0_34, %c0_35, %c0_36], %53 {strides = array<i32>} : memref<1x8x256xf32, #tpu.memory_space<vmem>>, vector<1x8x256xf32>,
    } else {
    }
    return
  }
  func.func @transform_0(%arg0: i32, %arg1: i32) -> (i32, i32, i32) {
    %c0_i32 = arith.constant 0 : i32
    %c0_i32_0 = arith.constant 0 : i32
    return %arg0, %c0_i32, %arg1 : i32, i32, i32
  }
  func.func @transform_1(%arg0: i32, %arg1: i32) -> (i32, i32) {
    %c0_i32 = arith.constant 0 : i32
    %c0_i32_0 = arith.constant 0 : i32
    %c0_i32_1 = arith.constant 0 : i32
    return %c0_i32, %c0_i32_0 : i32, i32
  }
  func.func @transform_2(%arg0: i32, %arg1: i32) -> (i32, i32) {
    %c0_i32 = arith.constant 0 : i32
    %c0_i32_0 = arith.constant 0 : i32
    %c0_i32_1 = arith.constant 0 : i32
    return %c0_i32, %c0_i32_0 : i32, i32
  }
  func.func @transform_3(%arg0: i32, %arg1: i32) -> (i32, i32) {
    %c0_i32 = arith.constant 0 : i32
    %c0_i32_0 = arith.constant 0 : i32
    %c0_i32_1 = arith.constant 0 : i32
    return %c0_i32, %c0_i32_0 : i32, i32
  }
  func.func @transform_4(%arg0: i32, %arg1: i32) -> (i32, i32, i32) {
    %c0_i32 = arith.constant 0 : i32
    %c0_i32_0 = arith.constant 0 : i32
    %c0_i32_1 = arith.constant 0 : i32
    return %arg0, %c0_i32, %c0_i32_0 : i32, i32, i32
  }
}

</mosaic_0001>

<bundles_post_ra>
// kernel: tpu_custom_call.1
= control target key start
LH: loop header
LB: loop body
LE: loop exit
PB: predicated region body
PF: predicated region fallthrough
CT: control target
= control target key end

     0   :  { %9 = vsyncpa [#allocation5], 0  ;;  %s778_s0 = inlined_call_operand.vmem [shape: bf16[2,36,256], index: 0, kind: input, shape index: {}]   ;;  %s779_s1 = inlined_call_operand.vmem [shape: bf16[8,36], index: 1, kind: input, shape index: {}]   ;;  %s780_s2 = inlined_call_operand.vmem [shape: f32[8,1], index: 2, kind: input, shape index: {}]   ;;  %s781_s3 = inlined_call_operand.vmem [shape: f32[8,1], index: 3, kind: input, shape index: {}]   ;;  %s782_s4 = inlined_call_operand.hbm [shape: f32[2,8,256], index: 4, kind: output, shape index: {}]  }
   0x1   :  { %11 = vsyncpa [#allocation5 + $0x1], 0  ;;  %s660_s15 = smov 0   ;;  %s662_s16 = smov 0  }
   0x2   :  { %s664_s17 = smov 0   ;;  %s666_s18 = smov 0  }
   0x3   :  { %s668_s19 = smov 0   ;;  %s670_s20 = smov 0  }
   0x4 LB: > { %s463_s21 = sadd.s32 4294967295, %s630_s20   ;;  %s464_s22 = sadd.s32 4294967294, %s630_s20   ;;  %s630_s20 = sphi %s670_s20, %s17_s20   ;;  %s626_s19 = sphi %s668_s19, %s789_s19   ;;  %s622_s18 = sphi %s666_s18, %s788_s18   ;;  %s618_s17 = sphi %s664_s17, %s787_s17   ;;  %s614_s16 = sphi %s662_s16, %s786_s16   ;;  %s610_s15 = sphi %s660_s15, %s785_s15  }
   0x5   : > { %s29_s23 = sadd.s32 1, %s626_s19  ;;  %s127_s24 = sadd.s32 1, %s618_s17 }
   0x6   : > { %p31_p0 = scmp.ge.s32.totalorder %s29_s23, 2  ;;  %p137_p1 = scmp.ne.s32.totalorder %s618_s17, %s614_s16 }
   0x7   : > { %p138_p2 = scmp.eq.s32.totalorder %s463_s21, 1  ;;  %p143_p3 = scmp.ne.s32.totalorder %s614_s16, %s610_s15 }
   0x8   : > { %s791_s23 = smov (%p31_p0, %s29_s23), 0  ;;  %p144_p5 = scmp.eq.s32.totalorder %s464_s22, 1 }
   0x9   : > { %p700_p4 = por %p138_p2, %p137_p1  ;;  %s124_s26 = ssub.s32 %s626_s19, %s791_s23 }
   0xa   : > { %p467_p6 = scmp.ge.s32.totalorder %s630_s20, 1  ;;  %p125_p7 = scmp.eq.s32.totalorder %s124_s26, 0 }
   0xb   : > { %p707_p8 = por %p144_p5, %p143_p3  ;;  %p184_p9 = scmp.lt.s32.totalorder %s630_s20, 3 }
   0xc   : > { %s713_s28 = scalar_select %p125_p7, %s618_s17, %s127_s24  }
   0xd   : > { %p185_p10 = pnand %p467_p6, %p184_p9 }
   0xe   : > { %p215_p11 = scmp.lt.s32.totalorder (!%p185_p10), %s622_s18, 1  ;;  %s211_s14 = sand.u32 (!%p185_p10), 1, %s614_s16  }
   0xf   : > { %188 = sbr.rel (%p185_p10) target bundleno = 556 (0x22c), region = 36  ;;  %s468_s21 = sshll.u32 (!%p185_p10), %s211_s14, 4 }
  0x10   : > { %s483_s22 = sshll.u32 (!%p185_p10), %s622_s18, 8  ;;  %s213_s24 = scalar_lea.vmem (!%p185_p10), [#allocation4], %s468_s21 }
  0x11   : > { %s388_s26 = sshll.u32 (!%p185_p10), %s213_s24, 4  ;;  %s738_s5 = scalar_lea.hbm (!%p185_p10), %s782_s4, %s483_s22  ;;  %s389_s26 = int_to_ptr.vmem [resolvable:$true] %s388_s26 }
  0x12   : > { %s374_s6 = scalar_lea.sflag (!%p185_p10), [#allocation5], %s211_s14 }
  0x14   : > { %v632_v0 = vmov 0   ;;  %s216_s29 = scalar_select %p215_p11, %s622_s18, 1  ;;  %vm267_vm0 = vcmask 1041408   ;;  %v232_v9 = vld [vmem:[%s779_s1] sm:$0xf]  ;;  %vm263_vm1 = vcmask 293888  }
  0x15   : > { %306 = vmatprep.mubr.bf16.mxu0 %v632_v0  ;;  %542 = vset.pattern.permute.xlu1 %v632_v0  ;;  %vm229_vm2 = vcmask 7168   ;;  %v633_v10 = vmov 0.0   ;;  %v346_v32 = vld [vmem:[%s780_s2] sm:$0xff]  ;;  %s634_s18 = smov [#allocation4]  }
  0x16   : > { %543 = vset.pattern.permute.xlu0 %v632_v0  ;;  %s484_s30 = smul.u32 40, %s216_s29  ;;  %230 = vst.msk [vmem:[#allocation2] sm:$0xff] %vm229_vm2, %v633_v10  ;;  %231 = vst.msk [vmem:[#allocation3] sm:$0xff] %vm229_vm2, %v633_v10  ;;  %v350_v35 = vld [vmem:[%s781_s3] sm:$0xff]  ;;  %s558_s8 = sshll.u32 %s634_s18, 4  ;;  %s559_s8 = int_to_ptr.vmem [resolvable:$false] %s558_s8 }
  0x17   : > { %s560_s9 = scalar_lea.vmem %s559_s8, 512  ;;  %p561_p1 = scmp.lt.s32.totalorder %s389_s26, %s559_s8 }
  0x18   : > { %s222_s7 = scalar_lea.vmem %s778_s0, %s484_s30 }
  0x19   : > { %v237_v1 = vld [vmem:[%s222_s7 + $0x20] sm:$0x33]  ;;  %v546_v4 = vld [vmem:[%s222_s7 + $0x14] ss:$8 sps:$4 sm:$0xff]   ;;  %v548_v6 = vld [vmem:[%s222_s7 + $0x10] ss:$8 sps:$4 sm:$0xff]  }
  0x1a   : > { %v475_v2 = vcombine.high %v237_v1, %v237_v1  ;;  %v474_v3 = vcombine.low %v237_v1, %v237_v1  ;;  %v549_v7 = vld [vmem:[%s222_s7 + $0x4] ss:$8 sps:$4 sm:$0xff]   ;;  %v551_v8 = vld [vmem:[%s222_s7] ss:$8 sps:$4 sm:$0xff]   ;;  %s554_s7 = scalar_lea.vmem %s389_s26, 256 }
  0x1b   : > { %p555_p12 = scmp.ne.s32.totalorder %s389_s26, %s554_s7  ;;  %p562_p2 = scmp.lt.s32.totalorder %s560_s9, %s554_s7 }
  0x1c   : > { %476 = vmatprep.subr.msk.bf16.mxu0 %vm267_vm0, %v475_v2  ;;  %v269_v5 = vsel %vm267_vm0, %v474_v3, 0 }
  0x1d   : > { %285 = vmatpush1.bf16.msra.mxu0 %v269_v5  ;;  %v315_v19 = vld [vmem:[#allocation2] sm:$0xff]  ;;  %v322_v22 = vld [vmem:[#allocation3] sm:$0xff]  ;;  %p556_p13 = pnand %p555_p12, %p700_p4  ;;  %p563_p3 = por %p562_p2, %p561_p1 }
  0x1e   : > { %286 = vmatprep.subr.bf16.mxu0 %v546_v4 }
  0x1f   : > { %p557_p0 = pneg %p556_p13 }
  0x21   : > { %287 = vmatpush1.bf16.msra.mxu0 %v548_v6  ;;  %p564_p5 = pnand %p563_p3, %p557_p0 }
  0x22   : > { %288 = vmatprep.subr.bf16.mxu0 %v549_v7 }
  0x25   : > { %289 = vmatpush1.bf16.msra.mxu0 %v551_v8 }
  0x28   : > { %477 = vmatmul.mubr.msk.bf16.vlgmr.msra.gmra.mxu0 %vm263_vm1, %v232_v9 }
  0xe8   : > { %v308_v11 = vpop.f32.mrf.mxu0 }
  0xe9   : > { %v323_v16 = vmul.f32 %v308_v11, %v308_v11 }
  0xea   : > { %v310_v12 = vpop.f32.mrf.mxu0 }
  0xeb   : > { %v316_v13 = vadd.f32 %v310_v12, %v308_v11  ;;  %v324_v14 = vmul.f32 %v310_v12, %v310_v12 }
  0xec   : > { %v312_v15 = vpop.f32.mrf.mxu0 }
  0xed   : > { %317 = vadd.xlane.f32.xlu0 %v316_v13  ;;  %v325_v18 = vadd.f32 %v324_v14, %v323_v16 }
  0xee   : > { %v313_v17 = vpop.f32.mrf.mxu0 }
  0xf1   : > { %326 = vadd.xlane.f32.xlu0 %v325_v18 }
 0x176   : > { %v318_v20 = vpop.xlane.xlu0 %317 }
 0x177   : > { %v319_v21 = vadd.f32 %v318_v20, %v315_v19 }
 0x179   : > { %321 = vst.msk [vmem:[#allocation2] sm:$0xff] %vm229_vm2, %v319_v21 }
 0x17a   : > { %v327_v23 = vpop.xlane.xlu0 %326 }
 0x17b   : > { %v328_v24 = vadd.f32 %v327_v23, %v322_v22 }
 0x17d   : > { %329 = vst.msk [vmem:[#allocation3] sm:$0xff] %vm229_vm2, %v328_v24 }
 0x180   : > { %v340_v25 = vld [vmem:[#allocation2] sm:$0xff] }
 0x181   : > { %v341_v26 = vmul.f32 0.00390625, %v340_v25 }
 0x183   : > { %v344_v29 = vmul.f32 %v341_v26, %v341_v26 }
 0x184   : > { %v342_v27 = vld [vmem:[#allocation3] sm:$0xff] }
 0x185   : > { %v343_v28 = vmul.f32 0.00390625, %v342_v27 }
 0x187   : > { %v345_v30 = vsub.f32 %v343_v28, %v344_v29 }
 0x189   : > { %v347_v31 = vadd.f32 1e-05, %v345_v30 }
 0x18b   : > { %552 = vrsqrt.f32 %v347_v31 }
 0x198   : > { %v553_v33 = vpop.eup %552 }
 0x199   : > { %v349_v34 = vmul.f32 %v553_v33, %v346_v32 }
 0x19b   : > { %357 = vperm.xlu1 %542, %v349_v34   ;;  %v351_v36 = vmul.f32 %v349_v34, %v341_v26 }
 0x19d   : > { %v352_v37 = vsub.f32 %v350_v35, %v351_v36 }
 0x19f   : > { %364 = vperm.xlu1 %542, %v352_v37  }
 0x216   : > { %v358_v38 = vpop.permute.xlu1 %357 }
 0x217   : > { %v360_v39 = vmul.f32 %v358_v38, %v308_v11  ;;  %v361_v40 = vmul.f32 %v358_v38, %v310_v12 }
 0x21a   : > { %v365_v41 = vpop.permute.xlu1 %364 }
 0x21b   : > { %v367_v42 = vadd.f32 %v365_v41, %v360_v39  ;;  %v368_v43 = vadd.f32 %v365_v41, %v361_v40 }
 0x21d   : > { %v369_v44 = vmax.f32 %v367_v42, 0.0  ;;  %v370_v45 = vmax.f32 %v368_v43, 0.0 }
 0x21f   : > { %371 = vst [vmem:[%s213_s24] sm:$0xff] %v369_v44  ;;  %372 = vst [vmem:[%s213_s24 + $0x8] sm:$0xff] %v370_v45 }
 0x220   : > { %567 = shalt.err (!%p564_p5)
}
 0x221   : > { %s568_s10 = scalar_lea.hbm %s738_s5, 256  ;;  %s572_s13 = scalar_lea.hbm %s782_s4, 512 }
 0x222   : > { %p569_p6 = scmp.ne.s32.totalorder %s738_s5, %s568_s10  ;;  %p573_p10 = scmp.lt.s32.totalorder %s738_s5, %s782_s4 }
 0x223   : > { %p574_p11 = scmp.lt.s32.totalorder %s572_s13, %s568_s10 }
 0x224   : > { %p570_p7 = pnand %p569_p6, %p700_p4 }
 0x225   : > { %p575_p12 = por %p574_p11, %p573_p10 }
 0x226   : > { %p571_p9 = pneg %p570_p7 }
 0x228   : > { %p576_p13 = pnand %p575_p12, %p571_p9 }
 0x22a   : > { %579 = shalt.err (!%p576_p13)
}
 0x22b   : > { %485 = dma.vmem_to_hbm [thread:$0]  (%p700_p4), %s389_s26, 256, %s738_s5, %s374_s6  }
 0x22c PF: > { %p491_p0 = scmp.ge.s32.totalorder %s630_s20, 2  ;;  %s400_s22 = sand.u32 1, %s610_s15  }
 0x22d   : > { %s401_s24 = scalar_lea.sflag [#allocation5], %s400_s22 }
 0x22e   : > { %p488_p1 = pnand %p491_p0, %p707_p8 }
 0x230   : > { %p489_p2 = pneg %p488_p1 }
 0x232   : > { %605 = dma.done.wait (%p489_p2), %s401_s24, 256  }
 0x233   : > { %607 = vsyncadd (%p489_p2), %s401_s24, 4294967040  ;;  %s17_s20 = sadd.s32 1, %s630_s20   ;;  %s785_s15 = smov %s614_s16 }
 0x234   : > { %p14_p3 = scmp.ge.s32.totalorder %s17_s20, 4   ;;  %s786_s16 = smov %s618_s17 }
 0x235   : > { %s787_s17 = smov %s713_s28  ;;  %s788_s18 = smov %s626_s19 }
 0x236   : > { %s789_s19 = smov %s791_s23  ;;  %16 = sbr.rel (!%p14_p3) target bundleno = 4 (0x4), region = 80 }
 0x23b   :  { %406 = vsyncpa [#allocation5], 1 }
 0x23c   :  { %408 = vsyncpa [#allocation5 + $0x1], 1 }

</bundles_post_ra>
